<compile_context>
chip_gen: v7x
topology: tpu7x:2x2x1
jax: 0.10.0
libtpu: 0.0.40
codegen_flags: <defaults>
</compile_context>

<pallas_src>
from functools import partial

import numpy as np
import jax
import jax.numpy as jnp
from jax.experimental import pallas as pl
from jax.experimental.pallas import tpu as pltpu


_VMEM_LIMIT = 32 * 1024 * 1024


def _round_up(x, m):
    return (x + m - 1) // m * m


def _detect_multicore():
    # v7x has 2 TensorCores per chip; v5e/v6e have 1.
    try:
        kind = jax.devices()[0].device_kind.lower()
    except Exception:
        return False
    return "v7" in kind


_MULTI_CORE = _detect_multicore()


# ----------------------------------------------------------------------------
# Pallas kernels
# ----------------------------------------------------------------------------

def _matmul_kernel_single(*refs, relu, has_res):
    """Single-K-step matmul: dot -> epilogue -> store (no acc scratch)."""
    if has_res:
        x_ref, w_ref, b_ref, r_ref, o_ref = refs
    else:
        x_ref, w_ref, b_ref, o_ref = refs
    y = jnp.dot(x_ref[...], w_ref[...], preferred_element_type=jnp.float32)
    y = y + b_ref[...]
    if has_res:
        y = y + r_ref[...].astype(jnp.float32)
    if relu:
        y = jnp.maximum(y, 0.0)
    o_ref[...] = y.astype(o_ref.dtype)


def _matmul_kernel_acc(*refs, relu, has_res):
    """Multi-K-step matmul with f32 accumulator scratch (K > 1024 only)."""
    if has_res:
        x_ref, w_ref, b_ref, r_ref, o_ref, acc_ref = refs
    else:
        x_ref, w_ref, b_ref, o_ref, acc_ref = refs

    @pl.when(pl.program_id(2) == 0)
    def _():
        acc_ref[...] = jnp.zeros_like(acc_ref)

    acc_ref[...] += jnp.dot(x_ref[...], w_ref[...],
                            preferred_element_type=jnp.float32)

    @pl.when(pl.program_id(2) == pl.num_programs(2) - 1)
    def _():
        y = acc_ref[...] + b_ref[...]
        if has_res:
            y = y + r_ref[...].astype(jnp.float32)
        if relu:
            y = jnp.maximum(y, 0.0)
        o_ref[...] = y.astype(o_ref.dtype)


def _conv3x3_kernel(x_ref, w_ref, b_ref, o_ref, *, Wp, rows, relu):
    """Direct 3x3 / stride-1 / pad-1 conv on the flattened padded raster.

    x_ref: (Min, Cin)  flattened zero-padded image (row-major over (Hp, Wp)).
    w_ref: (9, Cin, tn) per-tap weights.  o_ref: (rows, tn).
    Output raster row j corresponds to padded position (j // Wp, j % Wp);
    rows with j % Wp >= Wp-2 or j // Wp >= Hp-2 are garbage and sliced away
    by the wrapper.  Each tap is one contiguous shifted slice -> one matmul.
    """
    acc = None
    for kh in range(3):
        for kw in range(3):
            xs = x_ref[pl.ds(kh * Wp + kw, rows), :]
            p = jnp.dot(xs, w_ref[kh * 3 + kw],
                        preferred_element_type=jnp.float32)
            acc = p if acc is None else acc + p
    y = acc + b_ref[...]
    if relu:
        y = jnp.maximum(y, 0.0)
    o_ref[...] = y.astype(o_ref.dtype)


def _maxpool_kernel(q00_ref, q01_ref, q10_ref, q11_ref, o_ref):
    """3x3 / stride-2 / pad-1 max pool over one image (parity quadrants)."""
    quads = ((q00_ref[...], q01_ref[...]), (q10_ref[...], q11_ref[...]))
    ho, wo = o_ref.shape[1], o_ref.shape[2]
    acc = None
    for di in range(3):
        for dj in range(3):
            q = quads[di % 2][dj % 2]
            tap = q[:, di // 2:di // 2 + ho, dj // 2:dj // 2 + wo, :]
            acc = tap if acc is None else jnp.maximum(acc, tap)
    o_ref[...] = acc


def _global_avgpool_kernel(x_ref, o_ref):
    # (1, H, W, C) -> (1, C), mean accumulated in f32.
    o_ref[...] = jnp.mean(x_ref[...].astype(jnp.float32),
                          axis=(1, 2)).astype(o_ref.dtype)


# ----------------------------------------------------------------------------
# Tiling helpers
# ----------------------------------------------------------------------------

def _pick_m(M):
    Mp = _round_up(M, 16)                      # bf16 sublane packing
    tm = 16
    for t in range(min(512, Mp), 15, -16):
        if Mp % t == 0:
            tm = t
            break
    return Mp, tm


def _pick_k(K):
    Kp = _round_up(K, 128)
    if Kp <= 1024:
        return Kp, Kp                          # single K step
    for t in (1024, 512, 384, 256, 128):
        if Kp % t == 0:
            return Kp, t
    return Kp, 128


def _pick_n(N):
    Np = _round_up(N, 128)
    for t in range(min(512, Np), 127, -128):
        if Np % t == 0:
            return Np, t
    return Np, 128


# ----------------------------------------------------------------------------
# Pallas wrappers
# ----------------------------------------------------------------------------

@partial(jax.jit, static_argnames=("relu", "out_dtype"))
def matmul_bias(x, w, shift, residual=None, *, relu=False,
                out_dtype=jnp.bfloat16):
    """out = act((x @ w) + shift [+ residual]).

    bf16 operands, f32 accumulation.  Output N is padded to a multiple of 128
    (lane-dense stores); the padding is returned to the caller (carried
    channel padding).  Output M is sliced back to the true M.
    """
    M, K = x.shape
    Kw, N = w.shape
    assert K == Kw
    Mp, tm = _pick_m(M)
    Kp, tk = _pick_k(K)
    Np, tn = _pick_n(N)
    # v7x (2 TCs): prefer splitting M over narrowing the lane-dense N tile.
    if _MULTI_CORE and (Mp // tm) * (Np // tn) < 2 and tm >= 32:
        tm //= 2

    x = x.astype(jnp.bfloat16)
    w = w.astype(jnp.bfloat16)
    if (Mp, Kp) != (M, K):
        x = jnp.pad(x, ((0, Mp - M), (0, Kp - K)))
    if (Kp, Np) != (K, N):
        w = jnp.pad(w, ((0, Kp - K), (0, Np - N)))
    b = shift.astype(jnp.float32)
    if b.shape[0] != Np:
        b = jnp.pad(b, (0, Np - b.shape[0]))
    b = b.reshape(1, Np)

    has_res = residual is not None
    args = [x, w, b]
    if has_res:
        r = residual.astype(jnp.bfloat16)
        if (Mp, Np) != r.shape:
            r = jnp.pad(r, ((0, Mp - r.shape[0]), (0, Np - r.shape[1])))
        args.append(r)

    single_k = (Kp == tk)
    if single_k:
        grid = (Mp // tm, Np // tn)
        in_specs = [pl.BlockSpec((tm, tk), lambda i, j: (i, 0)),
                    pl.BlockSpec((tk, tn), lambda i, j: (0, j)),
                    pl.BlockSpec((1, tn), lambda i, j: (0, j))]
        if has_res:
            in_specs.append(pl.BlockSpec((tm, tn), lambda i, j: (i, j)))
        out_spec = pl.BlockSpec((tm, tn), lambda i, j: (i, j))
        scratch = []
        sem = ("parallel", "parallel")
        kern = partial(_matmul_kernel_single, relu=relu, has_res=has_res)
    else:
        grid = (Mp // tm, Np // tn, Kp // tk)
        in_specs = [pl.BlockSpec((tm, tk), lambda i, j, k: (i, k)),
                    pl.BlockSpec((tk, tn), lambda i, j, k: (k, j)),
                    pl.BlockSpec((1, tn), lambda i, j, k: (0, j))]
        if has_res:
            in_specs.append(pl.BlockSpec((tm, tn), lambda i, j, k: (i, j)))
        out_spec = pl.BlockSpec((tm, tn), lambda i, j, k: (i, j))
        scratch = [pltpu.VMEM((tm, tn), jnp.float32)]
        sem = ("parallel", "parallel", "arbitrary")
        kern = partial(_matmul_kernel_acc, relu=relu, has_res=has_res)

    out = pl.pallas_call(
        kern,
        out_shape=jax.ShapeDtypeStruct((Mp, Np), out_dtype),
        grid_spec=pltpu.PrefetchScalarGridSpec(
            num_scalar_prefetch=0,
            grid=grid,
            in_specs=in_specs,
            out_specs=out_spec,
            scratch_shapes=scratch,
        ),
        compiler_params=pltpu.CompilerParams(
            dimension_semantics=sem, vmem_limit_bytes=_VMEM_LIMIT),
    )(*args)
    if Mp != M:
        out = out[:M]
    return out


@partial(jax.jit, static_argnames=("relu",))
def conv3x3_s1(x, w2d, shift, *, relu=True):
    """Direct 3x3 / stride-1 / pad-1 conv (no im2col materialization).

    x: (N, H, W, Ca) bf16, possibly channel-padded (Ca >= cin).
    w2d: (9*cin, Npad) bf16 (taps ordered (kh, kw, cin)); shift: (Npad,) f32.
    """
    N, H, W, Ca = x.shape
    Npad = w2d.shape[1]
    cin = w2d.shape[0] // 9
    w9 = w2d.reshape(9, cin, Npad)
    if Ca != cin:                                  # carried channel padding
        w9 = jnp.pad(w9, ((0, 0), (0, Ca - cin), (0, 0)))
    w9 = w9.astype(jnp.bfloat16)

    Hp, Wp = H + 2, W + 2
    rows = _round_up(Hp * Wp, 16)                  # raster rows computed
    need = rows + 2 * Wp + 2                       # input rows required
    hextra = max(0, -(-(need - Hp * Wp) // Wp))    # ceil-div extra pad rows
    Min = (Hp + hextra) * Wp

    xp = jnp.pad(x.astype(jnp.bfloat16),
                 ((0, 0), (1, 1 + hextra), (1, 1), (0, 0)))
    xf = xp.reshape(N, Min, Ca)                    # free (contiguous) reshape
    b = shift.astype(jnp.float32).reshape(1, Npad)
    _, tn = _pick_n(Npad)

    out = pl.pallas_call(
        partial(_conv3x3_kernel, Wp=Wp, rows=rows, relu=relu),
        out_shape=jax.ShapeDtypeStruct((N, rows, Npad), jnp.bfloat16),
        grid_spec=pltpu.PrefetchScalarGridSpec(
            num_scalar_prefetch=0,
            grid=(N, Npad // tn),
            in_specs=[
                pl.BlockSpec((None, Min, Ca), lambda n, j: (n, 0, 0)),
                pl.BlockSpec((9, Ca, tn), lambda n, j: (0, 0, j)),
                pl.BlockSpec((1, tn), lambda n, j: (0, j)),
            ],
            out_specs=pl.BlockSpec((None, rows, tn), lambda n, j: (n, 0, j)),
        ),
        compiler_params=pltpu.CompilerParams(
            dimension_semantics=("parallel", "parallel"),
            vmem_limit_bytes=_VMEM_LIMIT),
    )(xf, w9, b)

    # Un-raster: valid outputs live at padded positions (:H, :W).
    y = out[:, :Hp * Wp, :].reshape(N, Hp, Wp, Npad)[:, :H, :W, :]
    return y


@partial(jax.jit, static_argnames=("stride", "relu"))
def conv1x1(x, w, shift, residual=None, *, stride=1, relu=False):
    """1x1 conv (+ folded BN shift, optional fused residual + ReLU)."""
    if stride > 1:
        # TODO(synk): XLA strided slice costs one extra pass; move in-kernel.
        x = x[:, ::stride, ::stride, :]
    N, H, W, Ca = x.shape
    if Ca != w.shape[0]:                           # carried channel padding
        w = jnp.pad(w, ((0, Ca - w.shape[0]), (0, 0)))
    cols = x.reshape(N * H * W, Ca)
    r2d = None
    if residual is not None:
        r2d = residual.reshape(N * H * W, residual.shape[-1])
    y = matmul_bias(cols, w, shift, r2d, relu=relu)
    return y.reshape(N, H, W, y.shape[-1])


def _im2col(x, k, stride, pad):
    """(N,H,W,C) -> (N*Ho*Wo, k*k*C) patches ordered (kh, kw, cin)."""
    N, H, W, C = x.shape
    Ho = (H + 2 * pad - k) // stride + 1
    Wo = (W + 2 * pad - k) // stride + 1
    xp = jnp.pad(x, ((0, 0), (pad, pad), (pad, pad), (0, 0)))
    cols = [xp[:, i:i + stride * Ho:stride, j:j + stride * Wo:stride, :]
            for i in range(k) for j in range(k)]
    patches = jnp.concatenate(cols, axis=-1)
    return patches.reshape(N * Ho * Wo, k * k * C), Ho, Wo


@partial(jax.jit, static_argnames=("k", "stride", "pad", "relu"))
def conv_im2col(x, w2d, shift, *, k, stride, pad, relu):
    """im2col conv path (conv1 7x7/s2 and the three 3x3/s2 convs only)."""
    N, H, W, Ca = x.shape
    kk = k * k
    cin_w = w2d.shape[0] // kk
    if Ca != cin_w:
        w2d = jnp.pad(w2d.reshape(kk, cin_w, w2d.shape[1]),
                      ((0, 0), (0, Ca - cin_w), (0, 0))
                      ).reshape(kk * Ca, w2d.shape[1])
    cols, Ho, Wo = _im2col(x, k, stride, pad)
    y = matmul_bias(cols, w2d, shift, relu=relu)
    return y.reshape(N, Ho, Wo, y.shape[-1])


@jax.jit
def maxpool_3x3_s2_p1(x):
    """3x3 / stride-2 / pad-1 max pool (ResNet stem), gridded over batch.

    TODO(synk): quadrant construction is still an XLA-side strided pass.
    """
    N, H, W, C = x.shape
    Ho, Wo = H // 2, W // 2
    xp = jnp.pad(x, ((0, 0), (1, 1), (1, 1), (0, 0)),
                 constant_values=-jnp.inf)
    quads = [xp[:, a::2, b::2, :] for a in (0, 1) for b in (0, 1)]
    Hq, Wq = quads[0].shape[1], quads[0].shape[2]
    return pl.pallas_call(
        _maxpool_kernel,
        out_shape=jax.ShapeDtypeStruct((N, Ho, Wo, C), x.dtype),
        grid_spec=pltpu.PrefetchScalarGridSpec(
            num_scalar_prefetch=0,
            grid=(N,),
            in_specs=[pl.BlockSpec((1, Hq, Wq, C), lambda n: (n, 0, 0, 0))] * 4,
            out_specs=pl.BlockSpec((1, Ho, Wo, C), lambda n: (n, 0, 0, 0)),
        ),
        compiler_params=pltpu.CompilerParams(
            dimension_semantics=("parallel",),
            vmem_limit_bytes=_VMEM_LIMIT),
    )(*quads)


@jax.jit
def global_avgpool(x):
    N, H, W, C = x.shape
    return pl.pallas_call(
        _global_avgpool_kernel,
        out_shape=jax.ShapeDtypeStruct((N, C), x.dtype),
        grid_spec=pltpu.PrefetchScalarGridSpec(
            num_scalar_prefetch=0,
            grid=(N,),
            in_specs=[pl.BlockSpec((1, H, W, C), lambda n: (n, 0, 0, 0))],
            out_specs=pl.BlockSpec((1, C), lambda n: (n, 0)),
        ),
        compiler_params=pltpu.CompilerParams(
            dimension_semantics=("parallel",),
            vmem_limit_bytes=_VMEM_LIMIT),
    )(x)


# ----------------------------------------------------------------------------
# Deterministic synthetic ResNet50 parameters (BN folded, bf16, cout padded)
# ----------------------------------------------------------------------------

_EXPANSION = 4
_STAGES = [(64, 3, 1), (128, 4, 2), (256, 6, 2), (512, 3, 2)]


def _conv_bn_folded(rng, cin, cout, k, eps=1e-5):
    fan_in = cin * k * k
    w = rng.normal(0.0, np.sqrt(2.0 / fan_in),
                   size=(k, k, cin, cout)).astype(np.float32)
    gamma = rng.uniform(0.8, 1.2, size=(cout,)).astype(np.float32)
    beta = rng.normal(0.0, 0.05, size=(cout,)).astype(np.float32)
    mean = rng.normal(0.0, 0.05, size=(cout,)).astype(np.float32)
    var = rng.uniform(0.8, 1.2, size=(cout,)).astype(np.float32)
    scale = gamma / np.sqrt(var + eps)
    shift = beta - mean * scale
    w_folded = (w * scale[None, None, None, :]).reshape(k * k * cin, cout)
    cpad = _round_up(cout, 128)                    # lane-dense output channels
    if cpad != cout:
        w_folded = np.pad(w_folded, ((0, 0), (0, cpad - cout)))
        shift = np.pad(shift, (0, cpad - cout))
    return (jnp.asarray(w_folded, dtype=jnp.bfloat16),
            jnp.asarray(shift, dtype=jnp.float32))


def build_resnet50_params(num_classes):
    rng = np.random.default_rng(0)
    params = {"conv1": _conv_bn_folded(rng, 3, 64, 7), "layers": []}
    cin = 64
    for width, nblocks, stage_stride in _STAGES:
        blocks = []
        for b in range(nblocks):
            s = stage_stride if b == 0 else 1
            cout = width * _EXPANSION
            blk = {
                "stride": s,
                "c1": _conv_bn_folded(rng, cin, width, 1),
                "c2": _conv_bn_folded(rng, width, width, 3),
                "c3": _conv_bn_folded(rng, width, cout, 1),
            }
            if s != 1 or cin != cout:
                blk["cd"] = _conv_bn_folded(rng, cin, cout, 1)
            blocks.append(blk)
            cin = cout
        params["layers"].append(blocks)

    bound = 1.0 / np.sqrt(2048.0)
    fc_w = rng.uniform(-bound, bound, size=(2048, num_classes)).astype(np.float32)
    fc_b = rng.uniform(-bound, bound, size=(num_classes,)).astype(np.float32)
    ncp = _round_up(num_classes, 128)
    fc_w = np.pad(fc_w, ((0, 0), (0, ncp - num_classes)))
    fc_b = np.pad(fc_b, (0, ncp - num_classes))
    params["fc_w"] = jnp.asarray(fc_w, dtype=jnp.bfloat16)
    params["fc_b"] = jnp.asarray(fc_b, dtype=jnp.float32)
    return params


# ----------------------------------------------------------------------------
# Forward pass
# ----------------------------------------------------------------------------

def _bottleneck(x, p):
    stride = p["stride"]
    if "cd" in p:
        wd, bd = p["cd"]
        identity = conv1x1(x, wd, bd, stride=stride, relu=False)
    else:
        identity = x
    w1, b1 = p["c1"]
    w2, b2 = p["c2"]
    w3, b3 = p["c3"]
    out = conv1x1(x, w1, b1, stride=1, relu=True)
    if stride == 1:
        out = conv3x3_s1(out, w2, b2, relu=True)          # direct conv (no im2col)
    else:
        out = conv_im2col(out, w2, b2, k=3, stride=stride, pad=1, relu=True)
    # Residual add + final ReLU fused into the conv3 matmul epilogue.
    out = conv1x1(out, w3, b3, residual=identity, stride=1, relu=True)
    return out


def resnet50_forward(params, x_nchw, num_classes):
    # NCHW (PyTorch) -> NHWC (lane-dense kernel layout), bf16 activations.
    x = jnp.transpose(x_nchw, (0, 2, 3, 1)).astype(jnp.bfloat16)

    w1, b1 = params["conv1"]
    x = conv_bn = conv_im2col(x, w1, b1, k=7, stride=2, pad=3, relu=True)
    x = maxpool_3x3_s2_p1(x)

    for blocks in params["layers"]:
        for blk in blocks:
            x = _bottleneck(x, blk)

    x = global_avgpool(x)                                  # (N, 2048)
    logits = matmul_bias(x, params["fc_w"], params["fc_b"],
                         relu=False, out_dtype=jnp.float32)
    return logits[:, :num_classes]                         # (N, num_classes)


# ----------------------------------------------------------------------------
# Main
# ----------------------------------------------------------------------------

if __name__ == "__main__":
    # NOTE: small shapes per harness requirements; realistic benchmarking
    # (batch >= 32, 224x224) should be done separately.
    num_classes = 10
    batch = 2

    params = build_resnet50_params(num_classes)

    key = jax.random.PRNGKey(0)
    x = jax.random.normal(key, (batch, 3, 32, 32), dtype=jnp.float32)

    logits = resnet50_forward(params, x, num_classes)
    logits = jax.block_until_ready(logits)

    assert logits.shape == (batch, num_classes), logits.shape
    assert bool(jnp.all(jnp.isfinite(logits))), "non-finite output"
    print("KERNEL_OK")
</pallas_src>

<mosaic_0001>
module attributes {stable_mosaic.version = 11 : i64} {
  func.func @_matmul_kernel_single(%arg0: i32, %arg1: i32, %arg2: memref<512x256xbf16, #tpu.memory_space<vmem>>, %arg3: memref<256x128xbf16, #tpu.memory_space<vmem>>, %arg4: memref<1x128xf32, #tpu.memory_space<vmem>>, %arg5: memref<512x128xbf16, #tpu.memory_space<vmem>>) attributes {dimension_semantics = [#tpu.dimension_semantics<parallel>, #tpu.dimension_semantics<parallel>], iteration_bounds = array<i64: 1, 1>, scalar_prefetch = 0 : i64, scratch_operands = 0 : i64, tpu.core_type = #tpu.core_type<tc>, window_params = [{transform_indices = @transform_0, window_bounds = array<i64: 512, 256>}, {transform_indices = @transform_1, window_bounds = array<i64: 256, 128>}, {transform_indices = @transform_2, window_bounds = array<i64: 1, 128>}, {transform_indices = @transform_3, window_bounds = array<i64: 512, 128>}]} {
    %c0 = arith.constant 0 : index
    %c0_0 = arith.constant 0 : index
    %0 = vector.load %arg2[%c0, %c0_0] : memref<512x256xbf16, #tpu.memory_space<vmem>>, vector<512x256xbf16>
    %c0_1 = arith.constant 0 : index
    %c0_2 = arith.constant 0 : index
    %1 = vector.load %arg3[%c0_1, %c0_2] : memref<256x128xbf16, #tpu.memory_space<vmem>>, vector<256x128xbf16>
    %cst = arith.constant dense<0.000000e+00> : vector<512x128xf32>
    %2 = tpu.matmul %0, %1, %cst {dimension_numbers = #tpu.dot_dimension_numbers<[1], [0], [0], [1], [0, 0, 1, 1], [], []>} : vector<512x256xbf16>, vector<256x128xbf16>, vector<512x128xf32> -> vector<512x128xf32>
    %c0_3 = arith.constant 0 : index
    %c0_4 = arith.constant 0 : index
    %3 = vector.load %arg4[%c0_3, %c0_4] : memref<1x128xf32, #tpu.memory_space<vmem>>, vector<1x128xf32>
    %4 = vector.broadcast %3 : vector<1x128xf32> to vector<512x128xf32>
    %5 = arith.addf %2, %4 : vector<512x128xf32>
    %cst_5 = arith.constant 0.000000e+00 : f32
    %6 = vector.broadcast %cst_5 : f32 to vector<512x128xf32>
    %7 = arith.maximumf %5, %6 : vector<512x128xf32>
    %8 = arith.truncf %7 : vector<512x128xf32> to vector<512x128xbf16>
    %c0_6 = arith.constant 0 : index
    %c0_7 = arith.constant 0 : index
    %9 = vector.load %arg5[%c0_6, %c0_7] : memref<512x128xbf16, #tpu.memory_space<vmem>>, vector<512x128xbf16>
    tpu.vector_store %arg5[%c0_6, %c0_7], %8 {strides = array<i32>} : memref<512x128xbf16, #tpu.memory_space<vmem>>, vector<512x128xbf16>,
    return
  }
  func.func @transform_0(%arg0: i32, %arg1: i32) -> (i32, i32) {
    %c0_i32 = arith.constant 0 : i32
    %c0_i32_0 = arith.constant 0 : i32
    return %arg0, %c0_i32 : i32, i32
  }
  func.func @transform_1(%arg0: i32, %arg1: i32) -> (i32, i32) {
    %c0_i32 = arith.constant 0 : i32
    %c0_i32_0 = arith.constant 0 : i32
    return %c0_i32, %arg1 : i32, i32
  }
  func.func @transform_2(%arg0: i32, %arg1: i32) -> (i32, i32) {
    %c0_i32 = arith.constant 0 : i32
    %c0_i32_0 = arith.constant 0 : i32
    return %c0_i32, %arg1 : i32, i32
  }
  func.func @transform_3(%arg0: i32, %arg1: i32) -> (i32, i32) {
    %c0_i32 = arith.constant 0 : i32
    return %arg0, %arg1 : i32, i32
  }
}

</mosaic_0001>

<bundles_post_ra>
// kernel: matmul_bias.1
= control target key start
LH: loop header
LB: loop body
LE: loop exit
PB: predicated region body
PF: predicated region fallthrough
CT: control target
= control target key end

     0   :  { %v1796_v1 = vmov 0   ;;  %s2173_s0 = inlined_call_operand.vmem [shape: bf16[512,256], index: 0, kind: input, shape index: {}]   ;;  %s2174_s1 = inlined_call_operand.vmem [shape: bf16[256,128], index: 1, kind: input, shape index: {}]   ;;  %s2175_s2 = inlined_call_operand.vmem [shape: f32[1,128], index: 2, kind: input, shape index: {}]   ;;  %s2176_s3 = inlined_call_operand.hbm [shape: bf16[512,128], index: 3, kind: output, shape index: {}]  }
   0x1   :  { %v1660_v0 = vld [vmem:[%s2174_s1] sm:$0xff]   ;;  %535 = vmatprep.subr.bf16.mxu0 %v1796_v1  ;;  %1624 = vmatprep.subr.bf16.mxu1 %v1796_v1  ;;  %v1661_v2 = vld [vmem:[%s2174_s1 + $0x8] sm:$0xff]   ;;  %v1662_v3 = vld [vmem:[%s2174_s1 + $0x10] sm:$0xff]  }
   0x2   :  { %536 = vmatpush1.bf16.msra.mxu0 %v1660_v0  ;;  %1640 = vmatpush1.bf16.msra.mxu1 %v1660_v0  ;;  %v1663_v4 = vld [vmem:[%s2174_s1 + $0x18] sm:$0xff]   ;;  %v1664_v5 = vld [vmem:[%s2174_s1 + $0x20] sm:$0xff]   ;;  %v1665_v7 = vld [vmem:[%s2174_s1 + $0x28] sm:$0xff]  }
   0x3   :  { %537 = vmatprep.subr.bf16.mxu0 %v1796_v1  ;;  %1625 = vmatprep.subr.bf16.mxu1 %v1796_v1  ;;  %v1678_v6 = vld [vmem:[%s2173_s0 + $0x4] ss:$8 sps:$4 sm:$0xff]   ;;  %v1666_v9 = vld [vmem:[%s2174_s1 + $0x30] sm:$0xff]   ;;  %v1667_v10 = vld [vmem:[%s2174_s1 + $0x38] sm:$0xff]  }
   0x4   :  { %v1681_v8 = vld [vmem:[%s2173_s0 + $0x104] ss:$8 sps:$4 sm:$0xff]   ;;  %567 = vmatprep.mubr.bf16.mxu0 %v1678_v6  ;;  %v1670_v13 = vld [vmem:[%s2174_s1 + $0x50] sm:$0xff]   ;;  %v1671_v14 = vld [vmem:[%s2174_s1 + $0x58] sm:$0xff]  }
   0x5   :  { %695 = vmatprep.mubr.bf16.mxu1 %v1681_v8  ;;  %v1668_v11 = vld [vmem:[%s2174_s1 + $0x40] sm:$0xff]   ;;  %v1669_v12 = vld [vmem:[%s2174_s1 + $0x48] sm:$0xff]   ;;  %v1674_v17 = vld [vmem:[%s2174_s1 + $0x70] sm:$0xff]  }
   0x6   :  { %538 = vmatpush1.bf16.msra.mxu0 %v1661_v2  ;;  %1641 = vmatpush1.bf16.msra.mxu1 %v1661_v2  ;;  %v1672_v15 = vld [vmem:[%s2174_s1 + $0x60] sm:$0xff]   ;;  %v1673_v16 = vld [vmem:[%s2174_s1 + $0x68] sm:$0xff]   ;;  %v1675_v18 = vld [vmem:[%s2174_s1 + $0x78] sm:$0xff]  }
   0x7   :  { %539 = vmatprep.subr.bf16.mxu0 %v1796_v1  ;;  %1626 = vmatprep.subr.bf16.mxu1 %v1796_v1 }
   0xa   :  { %540 = vmatpush1.bf16.msra.mxu0 %v1662_v3  ;;  %1642 = vmatpush1.bf16.msra.mxu1 %v1662_v3 }
   0xb   :  { %541 = vmatprep.subr.bf16.mxu0 %v1796_v1  ;;  %1627 = vmatprep.subr.bf16.mxu1 %v1796_v1 }
   0xe   :  { %542 = vmatpush1.bf16.msra.mxu0 %v1663_v4  ;;  %1643 = vmatpush1.bf16.msra.mxu1 %v1663_v4 }
   0xf   :  { %543 = vmatprep.subr.bf16.mxu0 %v1796_v1  ;;  %1628 = vmatprep.subr.bf16.mxu1 %v1796_v1 }
  0x12   :  { %544 = vmatpush1.bf16.msra.mxu0 %v1664_v5  ;;  %1644 = vmatpush1.bf16.msra.mxu1 %v1664_v5 }
  0x13   :  { %545 = vmatprep.subr.bf16.mxu0 %v1796_v1  ;;  %1629 = vmatprep.subr.bf16.mxu1 %v1796_v1 }
  0x16   :  { %546 = vmatpush1.bf16.msra.mxu0 %v1665_v7  ;;  %1645 = vmatpush1.bf16.msra.mxu1 %v1665_v7 }
  0x17   :  { %547 = vmatprep.subr.bf16.mxu0 %v1796_v1  ;;  %1630 = vmatprep.subr.bf16.mxu1 %v1796_v1 }
  0x1a   :  { %548 = vmatpush1.bf16.msra.mxu0 %v1666_v9  ;;  %1646 = vmatpush1.bf16.msra.mxu1 %v1666_v9 }
  0x1b   :  { %549 = vmatprep.subr.bf16.mxu0 %v1796_v1  ;;  %1631 = vmatprep.subr.bf16.mxu1 %v1796_v1 }
  0x1e   :  { %550 = vmatpush1.bf16.msra.mxu0 %v1667_v10  ;;  %1647 = vmatpush1.bf16.msra.mxu1 %v1667_v10 }
  0x1f   :  { %551 = vmatprep.subr.bf16.mxu0 %v1796_v1  ;;  %1632 = vmatprep.subr.bf16.mxu1 %v1796_v1 }
  0x22   :  { %552 = vmatpush1.bf16.msra.mxu0 %v1668_v11  ;;  %1648 = vmatpush1.bf16.msra.mxu1 %v1668_v11 }
  0x23   :  { %553 = vmatprep.subr.bf16.mxu0 %v1796_v1  ;;  %1633 = vmatprep.subr.bf16.mxu1 %v1796_v1 }
  0x26   :  { %554 = vmatpush1.bf16.msra.mxu0 %v1669_v12  ;;  %1649 = vmatpush1.bf16.msra.mxu1 %v1669_v12 }
  0x27   :  { %555 = vmatprep.subr.bf16.mxu0 %v1796_v1  ;;  %1634 = vmatprep.subr.bf16.mxu1 %v1796_v1 }
  0x2a   :  { %556 = vmatpush1.bf16.msra.mxu0 %v1670_v13  ;;  %1650 = vmatpush1.bf16.msra.mxu1 %v1670_v13 }
  0x2b   :  { %557 = vmatprep.subr.bf16.mxu0 %v1796_v1  ;;  %1635 = vmatprep.subr.bf16.mxu1 %v1796_v1 }
  0x2e   :  { %558 = vmatpush1.bf16.msra.mxu0 %v1671_v14  ;;  %1651 = vmatpush1.bf16.msra.mxu1 %v1671_v14 }
  0x2f   :  { %559 = vmatprep.subr.bf16.mxu0 %v1796_v1  ;;  %1636 = vmatprep.subr.bf16.mxu1 %v1796_v1 }
  0x32   :  { %560 = vmatpush1.bf16.msra.mxu0 %v1672_v15  ;;  %1652 = vmatpush1.bf16.msra.mxu1 %v1672_v15 }
  0x33   :  { %561 = vmatprep.subr.bf16.mxu0 %v1796_v1  ;;  %1637 = vmatprep.subr.bf16.mxu1 %v1796_v1 }
  0x36   :  { %562 = vmatpush1.bf16.msra.mxu0 %v1673_v16  ;;  %1653 = vmatpush1.bf16.msra.mxu1 %v1673_v16 }
  0x37   :  { %563 = vmatprep.subr.bf16.mxu0 %v1796_v1  ;;  %1638 = vmatprep.subr.bf16.mxu1 %v1796_v1 }
  0x3a   :  { %564 = vmatpush1.bf16.msra.mxu0 %v1674_v17  ;;  %1654 = vmatpush1.bf16.msra.mxu1 %v1674_v17 }
  0x3b   :  { %565 = vmatprep.subr.bf16.mxu0 %v1796_v1  ;;  %1639 = vmatprep.subr.bf16.mxu1 %v1796_v1 }
  0x3c   :  { %8 = vsyncpa [#allocation3], 0  ;;  %v1676_v19 = vld [vmem:[%s2173_s0] ss:$8 sps:$4 sm:$0xff]   ;;  %v1682_v21 = vld [vmem:[%s2173_s0 + $0x14] ss:$8 sps:$4 sm:$0xff]  }
  0x3d   :  { %v1679_v20 = vld [vmem:[%s2173_s0 + $0x100] ss:$8 sps:$4 sm:$0xff]   ;;  %v1684_v22 = vld [vmem:[%s2173_s0 + $0x114] ss:$8 sps:$4 sm:$0xff]   ;;  %v1686_v23 = vld [vmem:[%s2173_s0 + $0x10] ss:$8 sps:$4 sm:$0xff]  }
  0x3e   :  { %566 = vmatpush1.bf16.msra.mxu0 %v1675_v18  ;;  %1655 = vmatpush1.bf16.msra.mxu1 %v1675_v18  ;;  %v1687_v24 = vld [vmem:[%s2173_s0 + $0x110] ss:$8 sps:$4 sm:$0xff]   ;;  %v1688_v25 = vld [vmem:[%s2173_s0 + $0x24] ss:$8 sps:$4 sm:$0xff]   ;;  %v1692_v27 = vld [vmem:[%s2173_s0 + $0x20] ss:$8 sps:$4 sm:$0xff]  }
  0x3f   :  { %v1690_v26 = vld [vmem:[%s2173_s0 + $0x124] ss:$8 sps:$4 sm:$0xff]   ;;  %v1693_v28 = vld [vmem:[%s2173_s0 + $0x120] ss:$8 sps:$4 sm:$0xff]   ;;  %v1694_v29 = vld [vmem:[%s2173_s0 + $0x34] ss:$8 sps:$4 sm:$0xff]  }
  0x40   :  { %v1696_v30 = vld [vmem:[%s2173_s0 + $0x134] ss:$8 sps:$4 sm:$0xff]   ;;  %v1698_v31 = vld [vmem:[%s2173_s0 + $0x30] ss:$8 sps:$4 sm:$0xff]   ;;  %v1700_v33 = vld [vmem:[%s2173_s0 + $0x44] ss:$8 sps:$4 sm:$0xff]  }
  0x41   :  { %568 = vmatmul.mubr.bf16.vlgmr.msra.gmra.mrb[0].mxu0 %v1676_v19  ;;  %696 = vmatmul.mubr.bf16.vlgmr.msra.gmra.mrb[0].mxu1 %v1679_v20  ;;  %v1699_v32 = vld [vmem:[%s2173_s0 + $0x130] ss:$8 sps:$4 sm:$0xff]   ;;  %v1702_v34 = vld [vmem:[%s2173_s0 + $0x144] ss:$8 sps:$4 sm:$0xff]   ;;  %v1704_v35 = vld [vmem:[%s2173_s0 + $0x40] ss:$8 sps:$4 sm:$0xff]  }
  0x42   :  { %575 = vmatprep.mubr.bf16.mxu0 %v1682_v21  ;;  %703 = vmatprep.mubr.bf16.mxu1 %v1684_v22  ;;  %v1705_v36 = vld [vmem:[%s2173_s0 + $0x140] ss:$8 sps:$4 sm:$0xff]   ;;  %v1706_v37 = vld [vmem:[%s2173_s0 + $0x54] ss:$8 sps:$4 sm:$0xff]   ;;  %v1710_v39 = vld [vmem:[%s2173_s0 + $0x50] ss:$8 sps:$4 sm:$0xff]  }
  0x43   :  { %v1708_v38 = vld [vmem:[%s2173_s0 + $0x154] ss:$8 sps:$4 sm:$0xff]   ;;  %v1711_v40 = vld [vmem:[%s2173_s0 + $0x150] ss:$8 sps:$4 sm:$0xff]   ;;  %v1712_v41 = vld [vmem:[%s2173_s0 + $0x64] ss:$8 sps:$4 sm:$0xff]  }
  0x44   :  { %v1714_v42 = vld [vmem:[%s2173_s0 + $0x164] ss:$8 sps:$4 sm:$0xff]   ;;  %v1716_v43 = vld [vmem:[%s2173_s0 + $0x60] ss:$8 sps:$4 sm:$0xff]   ;;  %v1718_v45 = vld [vmem:[%s2173_s0 + $0x74] ss:$8 sps:$4 sm:$0xff]  }
  0x45   :  { %v1717_v44 = vld [vmem:[%s2173_s0 + $0x160] ss:$8 sps:$4 sm:$0xff]   ;;  %v1720_v46 = vld [vmem:[%s2173_s0 + $0x174] ss:$8 sps:$4 sm:$0xff]   ;;  %v1722_v47 = vld [vmem:[%s2173_s0 + $0x70] ss:$8 sps:$4 sm:$0xff]  }
  0x46   :  { %v1723_v48 = vld [vmem:[%s2173_s0 + $0x170] ss:$8 sps:$4 sm:$0xff]   ;;  %v1724_v49 = vld [vmem:[%s2173_s0 + $0x84] ss:$8 sps:$4 sm:$0xff]   ;;  %v1728_v51 = vld [vmem:[%s2173_s0 + $0x80] ss:$8 sps:$4 sm:$0xff]  }
  0x47   :  { %v1726_v50 = vld [vmem:[%s2173_s0 + $0x184] ss:$8 sps:$4 sm:$0xff]   ;;  %v1729_v52 = vld [vmem:[%s2173_s0 + $0x180] ss:$8 sps:$4 sm:$0xff]   ;;  %v1730_v53 = vld [vmem:[%s2173_s0 + $0x94] ss:$8 sps:$4 sm:$0xff]  }
  0x48   :  { %v1732_v54 = vld [vmem:[%s2173_s0 + $0x194] ss:$8 sps:$4 sm:$0xff]   ;;  %v1734_v55 = vld [vmem:[%s2173_s0 + $0x90] ss:$8 sps:$4 sm:$0xff]   ;;  %v1736_v57 = vld [vmem:[%s2173_s0 + $0xa4] ss:$8 sps:$4 sm:$0xff]  }
  0x49   :  { %576 = vmatmul.mubr.bf16.gmra.mrb[4].mxu0 %v1686_v23  ;;  %704 = vmatmul.mubr.bf16.gmra.mrb[4].mxu1 %v1687_v24  ;;  %v1735_v56 = vld [vmem:[%s2173_s0 + $0x190] ss:$8 sps:$4 sm:$0xff]   ;;  %v1738_v58 = vld [vmem:[%s2173_s0 + $0x1a4] ss:$8 sps:$4 sm:$0xff]   ;;  %v1740_v59 = vld [vmem:[%s2173_s0 + $0xa0] ss:$8 sps:$4 sm:$0xff]  }
  0x4a   :  { %583 = vmatprep.mubr.bf16.mxu0 %v1688_v25  ;;  %711 = vmatprep.mubr.bf16.mxu1 %v1690_v26  ;;  %v1741_v60 = vld [vmem:[%s2173_s0 + $0x1a0] ss:$8 sps:$4 sm:$0xff]   ;;  %v1742_v61 = vld [vmem:[%s2173_s0 + $0xb4] ss:$8 sps:$4 sm:$0xff]   ;;  %v1746_v63 = vld [vmem:[%s2173_s0 + $0xb0] ss:$8 sps:$4 sm:$0xff]  }
  0x4b   :  { %v1744_v62 = vld [vmem:[%s2173_s0 + $0x1b4] ss:$8 sps:$4 sm:$0xff]   ;;  %v1747_v0 = vld [vmem:[%s2173_s0 + $0x1b0] ss:$8 sps:$4 sm:$0xff]   ;;  %v1748_v1 = vld [vmem:[%s2173_s0 + $0xc4] ss:$8 sps:$4 sm:$0xff]  }
  0x4c   :  { %v1750_v2 = vld [vmem:[%s2173_s0 + $0x1c4] ss:$8 sps:$4 sm:$0xff]   ;;  %v1752_v3 = vld [vmem:[%s2173_s0 + $0xc0] ss:$8 sps:$4 sm:$0xff]   ;;  %v1754_v5 = vld [vmem:[%s2173_s0 + $0xd4] ss:$8 sps:$4 sm:$0xff]  }
  0x4d   :  { %v1753_v4 = vld [vmem:[%s2173_s0 + $0x1c0] ss:$8 sps:$4 sm:$0xff]   ;;  %v1756_v6 = vld [vmem:[%s2173_s0 + $0x1d4] ss:$8 sps:$4 sm:$0xff]   ;;  %v1758_v7 = vld [vmem:[%s2173_s0 + $0xd0] ss:$8 sps:$4 sm:$0xff]  }
  0x4e   :  { %v1759_v8 = vld [vmem:[%s2173_s0 + $0x1d0] ss:$8 sps:$4 sm:$0xff]   ;;  %v1760_v9 = vld [vmem:[%s2173_s0 + $0xe4] ss:$8 sps:$4 sm:$0xff]   ;;  %v1764_v11 = vld [vmem:[%s2173_s0 + $0xe0] ss:$8 sps:$4 sm:$0xff]  }
  0x4f   :  { %v1762_v10 = vld [vmem:[%s2173_s0 + $0x1e4] ss:$8 sps:$4 sm:$0xff]   ;;  %v1765_v12 = vld [vmem:[%s2173_s0 + $0x1e0] ss:$8 sps:$4 sm:$0xff]   ;;  %v1766_v13 = vld [vmem:[%s2173_s0 + $0xf4] ss:$8 sps:$4 sm:$0xff]  }
  0x50   :  { %v1768_v14 = vld [vmem:[%s2173_s0 + $0x1f4] ss:$8 sps:$4 sm:$0xff]   ;;  %v1770_v15 = vld [vmem:[%s2173_s0 + $0xf0] ss:$8 sps:$4 sm:$0xff]   ;;  %v2095_v17 = vld [vmem:[%s2175_s2] ss:$0 sm:$0xff] }
  0x51   :  { %584 = vmatmul.mubr.bf16.gmra.mrb[8].mxu0 %v1692_v27  ;;  %712 = vmatmul.mubr.bf16.gmra.mrb[8].mxu1 %v1693_v28  ;;  %v1771_v16 = vld [vmem:[%s2173_s0 + $0x1f0] ss:$8 sps:$4 sm:$0xff]   ;;  %s1797_s0 = smov [#allocation2]  }
  0x52   :  { %591 = vmatprep.mubr.bf16.mxu0 %v1694_v29  ;;  %719 = vmatprep.mubr.bf16.mxu1 %v1696_v30  ;;  %s1213_s2 = sshll.u32 %s1797_s0, 4  ;;  %s1214_s2 = int_to_ptr.vmem [resolvable:$true] %s1213_s2 }
  0x53   :  { %s1772_s7 = scalar_lea.vmem %s1214_s2, 4096  ;;  %p1777_p1 = scmp.lt.s32.totalorder %s1214_s2, %s1214_s2 }
  0x54   :  { %p1773_p0 = scmp.ne.s32.totalorder %s1214_s2, %s1772_s7  ;;  %p1778_p2 = scmp.lt.s32.totalorder %s1772_s7, %s1772_s7 }
  0x56   :  { %p1779_p3 = por %p1778_p2, %p1777_p1 }
  0x58   :  { %p1780_p4 = pnand %p1779_p3, %p1773_p0 }
  0x59   :  { %592 = vmatmul.mubr.bf16.gmra.mrb[12].mxu0 %v1698_v31  ;;  %720 = vmatmul.mubr.bf16.gmra.mrb[12].mxu1 %v1699_v32 }
  0x5a   :  { %599 = vmatprep.mubr.bf16.mxu0 %v1700_v33  ;;  %727 = vmatprep.mubr.bf16.mxu1 %v1702_v34 }
  0x61   :  { %600 = vmatmul.mubr.bf16.gmra.mrb[16].mxu0 %v1704_v35  ;;  %728 = vmatmul.mubr.bf16.gmra.mrb[16].mxu1 %v1705_v36 }
  0x62   :  { %607 = vmatprep.mubr.bf16.mxu0 %v1706_v37  ;;  %735 = vmatprep.mubr.bf16.mxu1 %v1708_v38 }
  0x69   :  { %608 = vmatmul.mubr.bf16.gmra.mrb[20].mxu0 %v1710_v39  ;;  %736 = vmatmul.mubr.bf16.gmra.mrb[20].mxu1 %v1711_v40 }
  0x6a   :  { %615 = vmatprep.mubr.bf16.mxu0 %v1712_v41  ;;  %743 = vmatprep.mubr.bf16.mxu1 %v1714_v42 }
  0x71   :  { %616 = vmatmul.mubr.bf16.gmra.mrb[24].mxu0 %v1716_v43  ;;  %744 = vmatmul.mubr.bf16.gmra.mrb[24].mxu1 %v1717_v44 }
  0x72   :  { %623 = vmatprep.mubr.bf16.mxu0 %v1718_v45  ;;  %751 = vmatprep.mubr.bf16.mxu1 %v1720_v46 }
  0x79   :  { %624 = vmatmul.mubr.bf16.gmra.mrb[28].mxu0 %v1722_v47  ;;  %752 = vmatmul.mubr.bf16.gmra.mrb[28].mxu1 %v1723_v48 }
  0x7a   :  { %631 = vmatprep.mubr.bf16.mxu0 %v1724_v49  ;;  %759 = vmatprep.mubr.bf16.mxu1 %v1726_v50 }
  0x81   :  { %632 = vmatmul.mubr.bf16.gmra.mrb[32].mxu0 %v1728_v51  ;;  %760 = vmatmul.mubr.bf16.gmra.mrb[32].mxu1 %v1729_v52 }
  0x82   :  { %639 = vmatprep.mubr.bf16.mxu0 %v1730_v53  ;;  %767 = vmatprep.mubr.bf16.mxu1 %v1732_v54 }
  0x89   :  { %640 = vmatmul.mubr.bf16.gmra.mrb[36].mxu0 %v1734_v55  ;;  %768 = vmatmul.mubr.bf16.gmra.mrb[36].mxu1 %v1735_v56 }
  0x8a   :  { %647 = vmatprep.mubr.bf16.mxu0 %v1736_v57  ;;  %775 = vmatprep.mubr.bf16.mxu1 %v1738_v58 }
  0x91   :  { %648 = vmatmul.mubr.bf16.gmra.mrb[40].mxu0 %v1740_v59  ;;  %776 = vmatmul.mubr.bf16.gmra.mrb[40].mxu1 %v1741_v60 }
  0x92   :  { %655 = vmatprep.mubr.bf16.mxu0 %v1742_v61  ;;  %783 = vmatprep.mubr.bf16.mxu1 %v1744_v62 }
  0x99   :  { %656 = vmatmul.mubr.bf16.gmra.mrb[44].mxu0 %v1746_v63  ;;  %784 = vmatmul.mubr.bf16.gmra.mrb[44].mxu1 %v1747_v0 }
  0x9a   :  { %663 = vmatprep.mubr.bf16.mxu0 %v1748_v1  ;;  %791 = vmatprep.mubr.bf16.mxu1 %v1750_v2 }
  0xa1   :  { %664 = vmatmul.mubr.bf16.gmra.mrb[48].mxu0 %v1752_v3  ;;  %792 = vmatmul.mubr.bf16.gmra.mrb[48].mxu1 %v1753_v4 }
  0xa2   :  { %671 = vmatprep.mubr.bf16.mxu0 %v1754_v5  ;;  %799 = vmatprep.mubr.bf16.mxu1 %v1756_v6 }
  0xa9   :  { %672 = vmatmul.mubr.bf16.gmra.mrb[52].mxu0 %v1758_v7  ;;  %800 = vmatmul.mubr.bf16.gmra.mrb[52].mxu1 %v1759_v8 }
  0xaa   :  { %679 = vmatprep.mubr.bf16.mxu0 %v1760_v9  ;;  %807 = vmatprep.mubr.bf16.mxu1 %v1762_v10 }
  0xb1   :  { %680 = vmatmul.mubr.bf16.gmra.mrb[56].mxu0 %v1764_v11  ;;  %808 = vmatmul.mubr.bf16.gmra.mrb[56].mxu1 %v1765_v12 }
  0xb2   :  { %687 = vmatprep.mubr.bf16.mxu0 %v1766_v13  ;;  %815 = vmatprep.mubr.bf16.mxu1 %v1768_v14 }
  0xb9   :  { %688 = vmatmul.mubr.bf16.gmra.mrb[60].mxu0 %v1770_v15  ;;  %816 = vmatmul.mubr.bf16.gmra.mrb[60].mxu1 %v1771_v16 }
 0x114   :  { %v569_v18 = vpop.f32.mrb[0].mxu0  ;;  %v697_v19 = vpop.f32.mrb[0].mxu1 }
 0x115   :  { %v570_v20 = vadd.f32 %v2095_v17, %v569_v18  ;;  %v698_v21 = vadd.f32 %v2095_v17, %v697_v19  ;;  %v571_v22 = vpop.f32.mrb[1].mxu0  ;;  %v699_v23 = vpop.f32.mrb[1].mxu1 }
 0x116   :  { %v572_v24 = vpop.f32.mrb[2].mxu0  ;;  %v700_v25 = vpop.f32.mrb[2].mxu1 }
 0x117   :  { %v573_v26 = vadd.f32 %v2095_v17, %v572_v24  ;;  %v701_v27 = vadd.f32 %v2095_v17, %v700_v25  ;;  %v574_v28 = vpop.f32.mrb[3].mxu0  ;;  %v702_v29 = vpop.f32.mrb[3].mxu1  ;;  %v824_v30 = vmax.f32 %v570_v20, 0.0  ;;  %v856_v31 = vmax.f32 %v698_v21, 0.0 }
 0x119   :  { %v825_v32 = vmax.f32 %v573_v26, 0.0  ;;  %v857_v33 = vmax.f32 %v701_v27, 0.0 }
 0x11b   :  { %v1436_v34 = vpack.c.bf16 %v825_v32, %v824_v30  ;;  %v1516_v35 = vpack.c.bf16 %v857_v33, %v856_v31 }
 0x11c   :  { %v577_v36 = vpop.f32.mrb[4].mxu0  ;;  %v705_v37 = vpop.f32.mrb[4].mxu1 }
 0x11d   :  { %1437 = vst [vmem:[#allocation2] sm:$0xff] %v1436_v34   ;;  %1608 = vst [vmem:[#allocation2 + $0x80] sm:$0xff] %v1516_v35   ;;  %v578_v38 = vadd.f32 %v2095_v17, %v577_v36  ;;  %v706_v39 = vadd.f32 %v2095_v17, %v705_v37  ;;  %v579_v40 = vpop.f32.mrb[5].mxu0  ;;  %v707_v41 = vpop.f32.mrb[5].mxu1 }
 0x11e   :  { %v580_v42 = vpop.f32.mrb[6].mxu0  ;;  %v708_v43 = vpop.f32.mrb[6].mxu1 }
 0x11f   :  { %v581_v44 = vadd.f32 %v2095_v17, %v580_v42  ;;  %v709_v45 = vadd.f32 %v2095_v17, %v708_v43  ;;  %v582_v46 = vpop.f32.mrb[7].mxu0  ;;  %v710_v47 = vpop.f32.mrb[7].mxu1  ;;  %v826_v48 = vmax.f32 %v578_v38, 0.0  ;;  %v858_v49 = vmax.f32 %v706_v39, 0.0 }
 0x121   :  { %v827_v50 = vmax.f32 %v581_v44, 0.0  ;;  %v859_v51 = vmax.f32 %v709_v45, 0.0 }
 0x123   :  { %v1441_v52 = vpack.c.bf16 %v827_v50, %v826_v48  ;;  %v1521_v53 = vpack.c.bf16 %v859_v51, %v858_v49 }
 0x124   :  { %v585_v54 = vpop.f32.mrb[8].mxu0  ;;  %v713_v55 = vpop.f32.mrb[8].mxu1 }
 0x125   :  { %1593 = vst [vmem:[#allocation2 + $0x8] sm:$0xff] %v1441_v52   ;;  %1609 = vst [vmem:[#allocation2 + $0x88] sm:$0xff] %v1521_v53   ;;  %v586_v56 = vadd.f32 %v2095_v17, %v585_v54  ;;  %v714_v57 = vadd.f32 %v2095_v17, %v713_v55  ;;  %v587_v58 = vpop.f32.mrb[9].mxu0  ;;  %v715_v59 = vpop.f32.mrb[9].mxu1 }
 0x126   :  { %v588_v60 = vpop.f32.mrb[10].mxu0  ;;  %v716_v61 = vpop.f32.mrb[10].mxu1 }
 0x127   :  { %v589_v62 = vadd.f32 %v2095_v17, %v588_v60  ;;  %v717_v63 = vadd.f32 %v2095_v17, %v716_v61  ;;  %v590_v0 = vpop.f32.mrb[11].mxu0  ;;  %v718_v1 = vpop.f32.mrb[11].mxu1  ;;  %v828_v2 = vmax.f32 %v586_v56, 0.0  ;;  %v860_v3 = vmax.f32 %v714_v57, 0.0 }
 0x129   :  { %v829_v4 = vmax.f32 %v589_v62, 0.0  ;;  %v861_v5 = vmax.f32 %v717_v63, 0.0 }
 0x12b   :  { %v1446_v6 = vpack.c.bf16 %v829_v4, %v828_v2  ;;  %v1526_v7 = vpack.c.bf16 %v861_v5, %v860_v3 }
 0x12c   :  { %v593_v8 = vpop.f32.mrb[12].mxu0  ;;  %v721_v9 = vpop.f32.mrb[12].mxu1 }
 0x12d   :  { %1594 = vst [vmem:[#allocation2 + $0x10] sm:$0xff] %v1446_v6   ;;  %1610 = vst [vmem:[#allocation2 + $0x90] sm:$0xff] %v1526_v7   ;;  %v594_v10 = vadd.f32 %v2095_v17, %v593_v8  ;;  %v722_v11 = vadd.f32 %v2095_v17, %v721_v9  ;;  %v595_v12 = vpop.f32.mrb[13].mxu0  ;;  %v723_v13 = vpop.f32.mrb[13].mxu1 }
 0x12e   :  { %v596_v14 = vpop.f32.mrb[14].mxu0  ;;  %v724_v15 = vpop.f32.mrb[14].mxu1 }
 0x12f   :  { %v597_v16 = vadd.f32 %v2095_v17, %v596_v14  ;;  %v725_v18 = vadd.f32 %v2095_v17, %v724_v15  ;;  %v598_v19 = vpop.f32.mrb[15].mxu0  ;;  %v726_v20 = vpop.f32.mrb[15].mxu1  ;;  %v830_v21 = vmax.f32 %v594_v10, 0.0  ;;  %v862_v22 = vmax.f32 %v722_v11, 0.0 }
 0x131   :  { %v831_v23 = vmax.f32 %v597_v16, 0.0  ;;  %v863_v24 = vmax.f32 %v725_v18, 0.0 }
 0x133   :  { %v1451_v25 = vpack.c.bf16 %v831_v23, %v830_v21  ;;  %v1531_v26 = vpack.c.bf16 %v863_v24, %v862_v22 }
 0x134   :  { %v601_v27 = vpop.f32.mrb[16].mxu0  ;;  %v729_v28 = vpop.f32.mrb[16].mxu1 }
 0x135   :  { %1595 = vst [vmem:[#allocation2 + $0x18] sm:$0xff] %v1451_v25   ;;  %1611 = vst [vmem:[#allocation2 + $0x98] sm:$0xff] %v1531_v26   ;;  %v602_v29 = vadd.f32 %v2095_v17, %v601_v27  ;;  %v730_v30 = vadd.f32 %v2095_v17, %v729_v28  ;;  %v603_v31 = vpop.f32.mrb[17].mxu0  ;;  %v731_v32 = vpop.f32.mrb[17].mxu1 }
 0x136   :  { %v604_v33 = vpop.f32.mrb[18].mxu0  ;;  %v732_v34 = vpop.f32.mrb[18].mxu1 }
 0x137   :  { %v605_v35 = vadd.f32 %v2095_v17, %v604_v33  ;;  %v733_v36 = vadd.f32 %v2095_v17, %v732_v34  ;;  %v606_v37 = vpop.f32.mrb[19].mxu0  ;;  %v734_v38 = vpop.f32.mrb[19].mxu1  ;;  %v832_v39 = vmax.f32 %v602_v29, 0.0  ;;  %v864_v40 = vmax.f32 %v730_v30, 0.0 }
 0x139   :  { %v833_v41 = vmax.f32 %v605_v35, 0.0  ;;  %v865_v42 = vmax.f32 %v733_v36, 0.0 }
 0x13b   :  { %v1456_v43 = vpack.c.bf16 %v833_v41, %v832_v39  ;;  %v1536_v44 = vpack.c.bf16 %v865_v42, %v864_v40 }
 0x13c   :  { %v609_v45 = vpop.f32.mrb[20].mxu0  ;;  %v737_v46 = vpop.f32.mrb[20].mxu1 }
 0x13d   :  { %1596 = vst [vmem:[#allocation2 + $0x20] sm:$0xff] %v1456_v43   ;;  %1612 = vst [vmem:[#allocation2 + $0xa0] sm:$0xff] %v1536_v44   ;;  %v610_v47 = vadd.f32 %v2095_v17, %v609_v45  ;;  %v738_v48 = vadd.f32 %v2095_v17, %v737_v46  ;;  %v611_v49 = vpop.f32.mrb[21].mxu0  ;;  %v739_v50 = vpop.f32.mrb[21].mxu1 }
 0x13e   :  { %v612_v51 = vpop.f32.mrb[22].mxu0  ;;  %v740_v52 = vpop.f32.mrb[22].mxu1 }
 0x13f   :  { %v613_v53 = vadd.f32 %v2095_v17, %v612_v51  ;;  %v741_v54 = vadd.f32 %v2095_v17, %v740_v52  ;;  %v614_v55 = vpop.f32.mrb[23].mxu0  ;;  %v742_v56 = vpop.f32.mrb[23].mxu1  ;;  %v834_v57 = vmax.f32 %v610_v47, 0.0  ;;  %v866_v58 = vmax.f32 %v738_v48, 0.0 }
 0x141   :  { %v835_v59 = vmax.f32 %v613_v53, 0.0  ;;  %v867_v60 = vmax.f32 %v741_v54, 0.0 }
 0x143   :  { %v1461_v61 = vpack.c.bf16 %v835_v59, %v834_v57  ;;  %v1541_v62 = vpack.c.bf16 %v867_v60, %v866_v58 }
 0x144   :  { %v617_v63 = vpop.f32.mrb[24].mxu0  ;;  %v745_v0 = vpop.f32.mrb[24].mxu1 }
 0x145   :  { %1597 = vst [vmem:[#allocation2 + $0x28] sm:$0xff] %v1461_v61   ;;  %1613 = vst [vmem:[#allocation2 + $0xa8] sm:$0xff] %v1541_v62   ;;  %v618_v1 = vadd.f32 %v2095_v17, %v617_v63  ;;  %v746_v2 = vadd.f32 %v2095_v17, %v745_v0  ;;  %v619_v3 = vpop.f32.mrb[25].mxu0  ;;  %v747_v4 = vpop.f32.mrb[25].mxu1 }
 0x146   :  { %v620_v5 = vpop.f32.mrb[26].mxu0  ;;  %v748_v6 = vpop.f32.mrb[26].mxu1 }
 0x147   :  { %v621_v7 = vadd.f32 %v2095_v17, %v620_v5  ;;  %v749_v8 = vadd.f32 %v2095_v17, %v748_v6  ;;  %v622_v9 = vpop.f32.mrb[27].mxu0  ;;  %v750_v10 = vpop.f32.mrb[27].mxu1  ;;  %v836_v11 = vmax.f32 %v618_v1, 0.0  ;;  %v868_v12 = vmax.f32 %v746_v2, 0.0 }
 0x149   :  { %v837_v13 = vmax.f32 %v621_v7, 0.0  ;;  %v869_v14 = vmax.f32 %v749_v8, 0.0 }
 0x14b   :  { %v1466_v15 = vpack.c.bf16 %v837_v13, %v836_v11  ;;  %v1546_v16 = vpack.c.bf16 %v869_v14, %v868_v12 }
 0x14c   :  { %v625_v18 = vpop.f32.mrb[28].mxu0  ;;  %v753_v19 = vpop.f32.mrb[28].mxu1 }
 0x14d   :  { %1598 = vst [vmem:[#allocation2 + $0x30] sm:$0xff] %v1466_v15   ;;  %1614 = vst [vmem:[#allocation2 + $0xb0] sm:$0xff] %v1546_v16   ;;  %v626_v20 = vadd.f32 %v2095_v17, %v625_v18  ;;  %v754_v21 = vadd.f32 %v2095_v17, %v753_v19  ;;  %v627_v22 = vpop.f32.mrb[29].mxu0  ;;  %v755_v23 = vpop.f32.mrb[29].mxu1 }
 0x14e   :  { %v628_v24 = vpop.f32.mrb[30].mxu0  ;;  %v756_v25 = vpop.f32.mrb[30].mxu1 }
 0x14f   :  { %v629_v26 = vadd.f32 %v2095_v17, %v628_v24  ;;  %v757_v27 = vadd.f32 %v2095_v17, %v756_v25  ;;  %v630_v28 = vpop.f32.mrb[31].mxu0  ;;  %v758_v29 = vpop.f32.mrb[31].mxu1  ;;  %v838_v30 = vmax.f32 %v626_v20, 0.0  ;;  %v870_v31 = vmax.f32 %v754_v21, 0.0 }
 0x151   :  { %v839_v32 = vmax.f32 %v629_v26, 0.0  ;;  %v871_v33 = vmax.f32 %v757_v27, 0.0 }
 0x153   :  { %v1471_v34 = vpack.c.bf16 %v839_v32, %v838_v30  ;;  %v1551_v35 = vpack.c.bf16 %v871_v33, %v870_v31 }
 0x154   :  { %v633_v36 = vpop.f32.mrb[32].mxu0  ;;  %v761_v37 = vpop.f32.mrb[32].mxu1 }
 0x155   :  { %1599 = vst [vmem:[#allocation2 + $0x38] sm:$0xff] %v1471_v34   ;;  %1615 = vst [vmem:[#allocation2 + $0xb8] sm:$0xff] %v1551_v35   ;;  %v634_v38 = vadd.f32 %v2095_v17, %v633_v36  ;;  %v762_v39 = vadd.f32 %v2095_v17, %v761_v37  ;;  %v635_v40 = vpop.f32.mrb[33].mxu0  ;;  %v763_v41 = vpop.f32.mrb[33].mxu1 }
 0x156   :  { %v636_v42 = vpop.f32.mrb[34].mxu0  ;;  %v764_v43 = vpop.f32.mrb[34].mxu1 }
 0x157   :  { %v637_v44 = vadd.f32 %v2095_v17, %v636_v42  ;;  %v765_v45 = vadd.f32 %v2095_v17, %v764_v43  ;;  %v638_v46 = vpop.f32.mrb[35].mxu0  ;;  %v766_v47 = vpop.f32.mrb[35].mxu1  ;;  %v840_v48 = vmax.f32 %v634_v38, 0.0  ;;  %v872_v49 = vmax.f32 %v762_v39, 0.0 }
 0x159   :  { %v841_v50 = vmax.f32 %v637_v44, 0.0  ;;  %v873_v51 = vmax.f32 %v765_v45, 0.0 }
 0x15b   :  { %v1476_v52 = vpack.c.bf16 %v841_v50, %v840_v48  ;;  %v1556_v53 = vpack.c.bf16 %v873_v51, %v872_v49 }
 0x15c   :  { %v641_v54 = vpop.f32.mrb[36].mxu0  ;;  %v769_v55 = vpop.f32.mrb[36].mxu1 }
 0x15d   :  { %1600 = vst [vmem:[#allocation2 + $0x40] sm:$0xff] %v1476_v52   ;;  %1616 = vst [vmem:[#allocation2 + $0xc0] sm:$0xff] %v1556_v53   ;;  %v642_v56 = vadd.f32 %v2095_v17, %v641_v54  ;;  %v770_v57 = vadd.f32 %v2095_v17, %v769_v55  ;;  %v643_v58 = vpop.f32.mrb[37].mxu0  ;;  %v771_v59 = vpop.f32.mrb[37].mxu1 }
 0x15e   :  { %v644_v60 = vpop.f32.mrb[38].mxu0  ;;  %v772_v61 = vpop.f32.mrb[38].mxu1 }
 0x15f   :  { %v645_v62 = vadd.f32 %v2095_v17, %v644_v60  ;;  %v773_v63 = vadd.f32 %v2095_v17, %v772_v61  ;;  %v646_v0 = vpop.f32.mrb[39].mxu0  ;;  %v774_v1 = vpop.f32.mrb[39].mxu1  ;;  %v842_v2 = vmax.f32 %v642_v56, 0.0  ;;  %v874_v3 = vmax.f32 %v770_v57, 0.0 }
 0x161   :  { %v843_v4 = vmax.f32 %v645_v62, 0.0  ;;  %v875_v5 = vmax.f32 %v773_v63, 0.0 }
 0x163   :  { %v1481_v6 = vpack.c.bf16 %v843_v4, %v842_v2  ;;  %v1561_v7 = vpack.c.bf16 %v875_v5, %v874_v3 }
 0x164   :  { %v649_v8 = vpop.f32.mrb[40].mxu0  ;;  %v777_v9 = vpop.f32.mrb[40].mxu1 }
 0x165   :  { %1601 = vst [vmem:[#allocation2 + $0x48] sm:$0xff] %v1481_v6   ;;  %1617 = vst [vmem:[#allocation2 + $0xc8] sm:$0xff] %v1561_v7   ;;  %v650_v10 = vadd.f32 %v2095_v17, %v649_v8  ;;  %v778_v11 = vadd.f32 %v2095_v17, %v777_v9  ;;  %v651_v12 = vpop.f32.mrb[41].mxu0  ;;  %v779_v13 = vpop.f32.mrb[41].mxu1 }
 0x166   :  { %v652_v14 = vpop.f32.mrb[42].mxu0  ;;  %v780_v15 = vpop.f32.mrb[42].mxu1 }
 0x167   :  { %v653_v16 = vadd.f32 %v2095_v17, %v652_v14  ;;  %v781_v18 = vadd.f32 %v2095_v17, %v780_v15  ;;  %v654_v19 = vpop.f32.mrb[43].mxu0  ;;  %v782_v20 = vpop.f32.mrb[43].mxu1  ;;  %v844_v21 = vmax.f32 %v650_v10, 0.0  ;;  %v876_v22 = vmax.f32 %v778_v11, 0.0 }
 0x169   :  { %v845_v23 = vmax.f32 %v653_v16, 0.0  ;;  %v877_v24 = vmax.f32 %v781_v18, 0.0 }
 0x16b   :  { %v1486_v25 = vpack.c.bf16 %v845_v23, %v844_v21  ;;  %v1566_v26 = vpack.c.bf16 %v877_v24, %v876_v22 }
 0x16c   :  { %v657_v27 = vpop.f32.mrb[44].mxu0  ;;  %v785_v28 = vpop.f32.mrb[44].mxu1 }
 0x16d   :  { %1602 = vst [vmem:[#allocation2 + $0x50] sm:$0xff] %v1486_v25   ;;  %1618 = vst [vmem:[#allocation2 + $0xd0] sm:$0xff] %v1566_v26   ;;  %v658_v29 = vadd.f32 %v2095_v17, %v657_v27  ;;  %v786_v30 = vadd.f32 %v2095_v17, %v785_v28  ;;  %v659_v31 = vpop.f32.mrb[45].mxu0  ;;  %v787_v32 = vpop.f32.mrb[45].mxu1 }
 0x16e   :  { %v660_v33 = vpop.f32.mrb[46].mxu0  ;;  %v788_v34 = vpop.f32.mrb[46].mxu1 }
 0x16f   :  { %v661_v35 = vadd.f32 %v2095_v17, %v660_v33  ;;  %v789_v36 = vadd.f32 %v2095_v17, %v788_v34  ;;  %v662_v37 = vpop.f32.mrb[47].mxu0  ;;  %v790_v38 = vpop.f32.mrb[47].mxu1  ;;  %v846_v39 = vmax.f32 %v658_v29, 0.0  ;;  %v878_v40 = vmax.f32 %v786_v30, 0.0 }
 0x171   :  { %v847_v41 = vmax.f32 %v661_v35, 0.0  ;;  %v879_v42 = vmax.f32 %v789_v36, 0.0 }
 0x173   :  { %v1491_v43 = vpack.c.bf16 %v847_v41, %v846_v39  ;;  %v1571_v44 = vpack.c.bf16 %v879_v42, %v878_v40 }
 0x174   :  { %v665_v45 = vpop.f32.mrb[48].mxu0  ;;  %v793_v46 = vpop.f32.mrb[48].mxu1 }
 0x175   :  { %1603 = vst [vmem:[#allocation2 + $0x58] sm:$0xff] %v1491_v43   ;;  %1619 = vst [vmem:[#allocation2 + $0xd8] sm:$0xff] %v1571_v44   ;;  %v666_v47 = vadd.f32 %v2095_v17, %v665_v45  ;;  %v794_v48 = vadd.f32 %v2095_v17, %v793_v46  ;;  %v667_v49 = vpop.f32.mrb[49].mxu0  ;;  %v795_v50 = vpop.f32.mrb[49].mxu1 }
 0x176   :  { %v668_v51 = vpop.f32.mrb[50].mxu0  ;;  %v796_v52 = vpop.f32.mrb[50].mxu1 }
 0x177   :  { %v669_v53 = vadd.f32 %v2095_v17, %v668_v51  ;;  %v797_v54 = vadd.f32 %v2095_v17, %v796_v52  ;;  %v670_v55 = vpop.f32.mrb[51].mxu0  ;;  %v798_v56 = vpop.f32.mrb[51].mxu1  ;;  %v848_v57 = vmax.f32 %v666_v47, 0.0  ;;  %v880_v58 = vmax.f32 %v794_v48, 0.0 }
 0x179   :  { %v849_v59 = vmax.f32 %v669_v53, 0.0  ;;  %v881_v60 = vmax.f32 %v797_v54, 0.0 }
 0x17b   :  { %v1496_v61 = vpack.c.bf16 %v849_v59, %v848_v57  ;;  %v1576_v62 = vpack.c.bf16 %v881_v60, %v880_v58 }
 0x17c   :  { %v673_v63 = vpop.f32.mrb[52].mxu0  ;;  %v801_v0 = vpop.f32.mrb[52].mxu1 }
 0x17d   :  { %1604 = vst [vmem:[#allocation2 + $0x60] sm:$0xff] %v1496_v61   ;;  %1620 = vst [vmem:[#allocation2 + $0xe0] sm:$0xff] %v1576_v62   ;;  %v674_v1 = vadd.f32 %v2095_v17, %v673_v63  ;;  %v802_v2 = vadd.f32 %v2095_v17, %v801_v0  ;;  %v675_v3 = vpop.f32.mrb[53].mxu0  ;;  %v803_v4 = vpop.f32.mrb[53].mxu1 }
 0x17e   :  { %v676_v5 = vpop.f32.mrb[54].mxu0  ;;  %v804_v6 = vpop.f32.mrb[54].mxu1 }
 0x17f   :  { %v677_v7 = vadd.f32 %v2095_v17, %v676_v5  ;;  %v805_v8 = vadd.f32 %v2095_v17, %v804_v6  ;;  %v678_v9 = vpop.f32.mrb[55].mxu0  ;;  %v806_v10 = vpop.f32.mrb[55].mxu1  ;;  %v850_v11 = vmax.f32 %v674_v1, 0.0  ;;  %v882_v12 = vmax.f32 %v802_v2, 0.0 }
 0x181   :  { %v851_v13 = vmax.f32 %v677_v7, 0.0  ;;  %v883_v14 = vmax.f32 %v805_v8, 0.0 }
 0x183   :  { %v1501_v15 = vpack.c.bf16 %v851_v13, %v850_v11  ;;  %v1581_v16 = vpack.c.bf16 %v883_v14, %v882_v12 }
 0x184   :  { %v681_v18 = vpop.f32.mrb[56].mxu0  ;;  %v809_v19 = vpop.f32.mrb[56].mxu1 }
 0x185   :  { %1605 = vst [vmem:[#allocation2 + $0x68] sm:$0xff] %v1501_v15   ;;  %1621 = vst [vmem:[#allocation2 + $0xe8] sm:$0xff] %v1581_v16   ;;  %v682_v20 = vadd.f32 %v2095_v17, %v681_v18  ;;  %v810_v21 = vadd.f32 %v2095_v17, %v809_v19  ;;  %v683_v22 = vpop.f32.mrb[57].mxu0  ;;  %v811_v23 = vpop.f32.mrb[57].mxu1 }
 0x186   :  { %v684_v24 = vpop.f32.mrb[58].mxu0  ;;  %v812_v25 = vpop.f32.mrb[58].mxu1 }
 0x187   :  { %v685_v26 = vadd.f32 %v2095_v17, %v684_v24  ;;  %v813_v27 = vadd.f32 %v2095_v17, %v812_v25  ;;  %v686_v28 = vpop.f32.mrb[59].mxu0  ;;  %v814_v29 = vpop.f32.mrb[59].mxu1  ;;  %v852_v30 = vmax.f32 %v682_v20, 0.0  ;;  %v884_v31 = vmax.f32 %v810_v21, 0.0 }
 0x189   :  { %v853_v32 = vmax.f32 %v685_v26, 0.0  ;;  %v885_v33 = vmax.f32 %v813_v27, 0.0 }
 0x18b   :  { %v1506_v34 = vpack.c.bf16 %v853_v32, %v852_v30  ;;  %v1586_v35 = vpack.c.bf16 %v885_v33, %v884_v31 }
 0x18c   :  { %v689_v36 = vpop.f32.mrb[60].mxu0  ;;  %v817_v37 = vpop.f32.mrb[60].mxu1 }
 0x18d   :  { %1606 = vst [vmem:[#allocation2 + $0x70] sm:$0xff] %v1506_v34   ;;  %1622 = vst [vmem:[#allocation2 + $0xf0] sm:$0xff] %v1586_v35   ;;  %v690_v38 = vadd.f32 %v2095_v17, %v689_v36  ;;  %v818_v39 = vadd.f32 %v2095_v17, %v817_v37  ;;  %v691_v40 = vpop.f32.mrb[61].mxu0  ;;  %v819_v41 = vpop.f32.mrb[61].mxu1 }
 0x18e   :  { %v692_v42 = vpop.f32.mrb[62].mxu0  ;;  %v820_v43 = vpop.f32.mrb[62].mxu1 }
 0x18f   :  { %v693_v44 = vadd.f32 %v2095_v17, %v692_v42  ;;  %v821_v45 = vadd.f32 %v2095_v17, %v820_v43  ;;  %v694_v46 = vpop.f32.mrb[63].mxu0  ;;  %v822_v47 = vpop.f32.mrb[63].mxu1  ;;  %v854_v48 = vmax.f32 %v690_v38, 0.0  ;;  %v886_v49 = vmax.f32 %v818_v39, 0.0 }
 0x191   :  { %v855_v50 = vmax.f32 %v693_v44, 0.0  ;;  %v887_v51 = vmax.f32 %v821_v45, 0.0 }
 0x193   :  { %v1511_v52 = vpack.c.bf16 %v855_v50, %v854_v48  ;;  %v1591_v53 = vpack.c.bf16 %v887_v51, %v886_v49 }
 0x195   :  { %1607 = vst [vmem:[#allocation2 + $0x78] sm:$0xff] %v1511_v52   ;;  %1623 = vst [vmem:[#allocation2 + $0xf8] sm:$0xff] %v1591_v53  }
 0x196   :  { %1783 = shalt.err (!%p1780_p4)
}
 0x197   :  { %s1784_s10 = scalar_lea.hbm %s2176_s3, 4096 }
 0x198   :  { %p1785_p5 = scmp.ne.s32.totalorder %s2176_s3, %s1784_s10  ;;  %p1788_p6 = scmp.lt.u32.totalorder %s1784_s10, %s2176_s3 }
 0x19a   :  { %p1790_p7 = pnand %p1788_p6, %p1785_p5 }
 0x19c   :  { %1793 = shalt.err (!%p1790_p7)
}
 0x19d   :  { %s1798_s15 = smov 64   ;;  %s1799_s16 = smov 4  }
 0x19e   :  { %1219 = dma.vmem_to_hbm [thread:$0]  %s1214_s2, 4096, %s2176_s3, [#allocation3], %s1798_s15, %s1798_s15, %s1799_s16  }
 0x19f   :  { %1794 = dma.done.wait [#allocation3], 4096  }
 0x1a0   :  { %1795 = vsyncadd [#allocation3], 4294963200 }
 0x1a1   :  { %1223 = vsyncpa [#allocation3], 1 }

</bundles_post_ra>
